<compile_context>
chip_gen: v7x
topology: tpu7x:2x2x1
jax: 0.10.0
libtpu: 0.0.40
codegen_flags: <defaults>
</compile_context>

<pallas_src>
import functools

import jax
import jax.numpy as jnp
from jax.experimental import pallas as pl
from jax.experimental.pallas import tpu as pltpu


def _round_up(x, m):
    return ((x + m - 1) // m) * m


def _choose_tile_rows(n, c, itemsize, buffers=3):
    # Bytes of VMEM consumed per tile row:
    #   buffers x (one logits row + the int32 target row, which lane-pads
    #   from 1 to 128 columns in VMEM)  +  ~4 full-width f32/int32
    #   temporaries (f32 cast, shifted, exp_shifted, iota/onehot) that spill
    #   once live values exceed the 64-vreg register file.
    per_row = buffers * (c * itemsize + 128 * 4) + 4 * c * 4
    budget = 24 * 1024 * 1024              # v7x-safe (64 MiB physical VMEM)
    tile_rows = budget // max(1, per_row)
    # Keep each logits DMA in the ~1-4 MiB sweet spot; bigger buys nothing.
    dma_cap = (4 * 1024 * 1024) // max(1, c * itemsize)
    tile_rows = min(tile_rows, dma_cap)
    tile_rows = max(8, (tile_rows // 8) * 8)
    # Never tile beyond the (8-aligned) batch itself.
    tile_rows = min(tile_rows, _round_up(n, 8))
    # Keep >= 2 tiles for batches that can afford it so the "parallel" batch
    # axis can shard across both TensorCores on v7x.
    if n >= 16:
        half = max(8, _round_up((n + 1) // 2, 8))
        tile_rows = min(tile_rows, half)
    return int(tile_rows)


def _focal_loss_kernel(logits_ref, target_ref, out_ref, *, gamma, alpha,
                       n_rows, tile_rows):
    # f32 math regardless of HBM dtype (bf16 inputs supported).
    logits = logits_ref[...].astype(jnp.float32)          # (TN, C)
    tgt = target_ref[...]                                  # (TN, 1) int32

    tn, c = logits.shape

    # Numerically-stable softmax pieces.
    row_max = jnp.max(logits, axis=-1, keepdims=True)      # (TN, 1)
    shifted = logits - row_max                              # (TN, C)
    exp_shifted = jnp.exp(shifted)                          # (TN, C)
    sum_exp = jnp.sum(exp_shifted, axis=-1, keepdims=True)  # (TN, 1)

    # Gather the target-class *shifted* logit via a one-hot mask (no dynamic
    # gather on TPU; row_max cancels algebraically). For f32 input this chain
    # is free filler under the HBM-bound roofline.
    class_ids = jax.lax.broadcasted_iota(jnp.int32, (tn, c), 1)          # (TN, C)
    onehot = class_ids == tgt                                            # (TN, C)
    tgt_shifted = jnp.sum(jnp.where(onehot, shifted, 0.0),
                          axis=-1, keepdims=True)                        # (TN, 1)

    # Per-sample cross entropy; pt = exp(-ce) (no divide, one per-row exp).
    ce = jnp.log(sum_exp) - tgt_shifted                                  # (TN, 1)
    pt = jnp.exp(-ce)                                                    # (TN, 1)

    # Focal modulation; specialize small integer gamma to a multiply chain
    # (avoids log+exp on the EUP and pow edge cases).
    one_minus_pt = 1.0 - pt
    g = float(gamma)
    if g == float(int(g)) and 0 <= int(g) <= 4:
        focal_pow = jnp.ones_like(one_minus_pt)
        for _ in range(int(g)):
            focal_pow = focal_pow * one_minus_pt
    else:
        focal_pow = jnp.power(one_minus_pt, g)

    loss = (alpha * focal_pow) * ce                                      # (TN, 1)

    # Mask rows padded past the true batch size (only matters in the last
    # tile). Keep this a select — padded rows may hold garbage/NaN.
    row_base = pl.program_id(0) * tile_rows
    row_ids = row_base + jax.lax.broadcasted_iota(jnp.int32, (tn, 1), 0)
    loss = jnp.where(row_ids < n_rows, loss, 0.0)

    # One partial sum per tile, broadcast into a lane-dense (8, 128) block so
    # the store is an unmasked vst and the block shape is (8, 128)-compliant.
    tile_sum = jnp.sum(loss, axis=0, keepdims=True)                      # (1, 1)
    out_ref[...] = jnp.broadcast_to(tile_sum, out_ref.shape)


def focal_loss(logits, target, gamma=2.0, alpha=1.0, tile_rows=None):
    """logits: (N, C) float (f32 or bf16); target: (N,) int. Returns scalar
    f32 mean focal loss (scalar-alpha branch of the PyTorch module)."""
    n, c = logits.shape
    target2d = target.astype(jnp.int32).reshape(n, 1)
    itemsize = jnp.dtype(logits.dtype).itemsize

    if tile_rows is None:
        tile_rows = _choose_tile_rows(n, c, itemsize)
    tile_rows = max(8, (int(tile_rows) // 8) * 8)
    tile_rows = min(tile_rows, _round_up(n, 8))
    num_tiles = pl.cdiv(n, tile_rows)

    kernel = functools.partial(
        _focal_loss_kernel,
        gamma=float(gamma),
        alpha=float(alpha),
        n_rows=n,
        tile_rows=tile_rows,
    )

    # Scoped-VMEM limit: cover the actual footprint (pipelined buffers + lane
    # padded target + spilled f32 temporaries) with headroom; 32-48 MiB is
    # safe on v5e/v6e (128 MiB physical) and v7x (64 MiB physical).
    per_row = 3 * (c * itemsize + 128 * 4) + 4 * c * 4
    vmem_need = tile_rows * per_row + (2 << 20)
    vmem_limit = int(min(48 << 20, max(32 << 20, vmem_need)))

    # Deeper logits buffering only pays off when the grid has several steps.
    if num_tiles >= 4:
        logits_spec = pl.BlockSpec((tile_rows, c), lambda i: (i, 0),
                                   pipeline_mode=pl.Buffered(3))
    else:
        logits_spec = pl.BlockSpec((tile_rows, c), lambda i: (i, 0))

    cost = pl.CostEstimate(
        flops=int(6 * n * c),
        transcendentals=int(n * c + 2 * n),
        bytes_accessed=int(n * c * itemsize + n * 4 + num_tiles * 8 * 128 * 4),
    )

    partials = pl.pallas_call(
        kernel,
        out_shape=jax.ShapeDtypeStruct((num_tiles * 8, 128), jnp.float32),
        grid_spec=pl.GridSpec(
            grid=(num_tiles,),
            in_specs=[
                logits_spec,
                pl.BlockSpec((tile_rows, 1), lambda i: (i, 0)),
            ],
            out_specs=pl.BlockSpec((8, 128), lambda i: (i, 0)),
        ),
        compiler_params=pltpu.CompilerParams(
            dimension_semantics=("parallel",),
            vmem_limit_bytes=vmem_limit,
        ),
        cost_estimate=cost,
    )(logits, target2d)

    # Each tile wrote its partial sum broadcast over its (8, 128) block; pick
    # one element per tile, reduce, and divide by the true N.
    tile_sums = partials.reshape(num_tiles, 8, 128)[:, 0, 0]
    return jnp.sum(tile_sums) / jnp.float32(n)


def _focal_loss_ref(logits, target, gamma=2.0, alpha=1.0):
    """Pure-JAX reference mirroring torch F.cross_entropy + focal term."""
    logits = logits.astype(jnp.float32)
    logz = jax.nn.logsumexp(logits, axis=-1)
    tgt_logit = jnp.take_along_axis(logits, target[:, None], axis=-1)[:, 0]
    ce = logz - tgt_logit
    pt = jnp.exp(-ce)
    return jnp.mean(alpha * (1.0 - pt) ** gamma * ce)


if __name__ == "__main__":
    key = jax.random.PRNGKey(0)
    k1, k2, k3, k4, k5, k6 = jax.random.split(key, 6)

    # Case 1: module-consistent small shapes (batch=8, classes=32), f32,
    # automatic tile sizing (single tile).
    N, C = 8, 32
    logits = jax.random.normal(k1, (N, C), dtype=jnp.float32)
    target = jax.random.randint(k2, (N,), 0, C, dtype=jnp.int32)

    loss = jax.block_until_ready(focal_loss(logits, target, gamma=2.0, alpha=1.0))
    ref = _focal_loss_ref(logits, target, gamma=2.0, alpha=1.0)
    assert jnp.allclose(loss, ref, atol=1e-5, rtol=1e-5), (loss, ref)

    # Case 2: bf16 logits, batch not a multiple of the tile (exercises masking
    # of padded rows and the multi-tile parallel partial-sum path).
    N2, C2 = 13, 32
    logits_bf16 = jax.random.normal(k3, (N2, C2), dtype=jnp.float32).astype(jnp.bfloat16)
    target2 = jax.random.randint(k4, (N2,), 0, C2, dtype=jnp.int32)

    loss2 = jax.block_until_ready(
        focal_loss(logits_bf16, target2, gamma=2.0, alpha=0.5, tile_rows=8)
    )
    ref2 = _focal_loss_ref(logits_bf16.astype(jnp.float32), target2, gamma=2.0, alpha=0.5)
    assert jnp.allclose(loss2, ref2, atol=1e-4, rtol=1e-4), (loss2, ref2)

    # Case 3: many tiles (exercises Buffered(3) pipelining and the
    # non-integer-gamma jnp.power path).
    N3, C3 = 1024, 32
    logits3 = jax.random.normal(k5, (N3, C3), dtype=jnp.float32)
    target3 = jax.random.randint(k6, (N3,), 0, C3, dtype=jnp.int32)

    loss3 = jax.block_until_ready(
        focal_loss(logits3, target3, gamma=1.5, alpha=0.25, tile_rows=128)
    )
    ref3 = _focal_loss_ref(logits3, target3, gamma=1.5, alpha=0.25)
    assert jnp.allclose(loss3, ref3, atol=1e-5, rtol=1e-4), (loss3, ref3)

    print("KERNEL_OK")
</pallas_src>

<mosaic_0001>
module attributes {stable_mosaic.version = 11 : i64} {
  func.func @_focal_loss_kernel(%arg0: i32, %arg1: memref<8x32xf32, #tpu.memory_space<vmem>>, %arg2: memref<8x1xi32, #tpu.memory_space<vmem>>, %arg3: memref<8x128xf32, #tpu.memory_space<vmem>>) attributes {dimension_semantics = [#tpu.dimension_semantics<parallel>], iteration_bounds = array<i64: 1>, scalar_prefetch = 0 : i64, scratch_operands = 0 : i64, tpu.core_type = #tpu.core_type<tc>, window_params = [{transform_indices = @transform_0, window_bounds = array<i64: 8, 32>}, {transform_indices = @transform_1, window_bounds = array<i64: 8, 1>}, {transform_indices = @transform_2, window_bounds = array<i64: 8, 128>}]} {
    %c0 = arith.constant 0 : index
    %c0_0 = arith.constant 0 : index
    %0 = vector.load %arg1[%c0, %c0_0] : memref<8x32xf32, #tpu.memory_space<vmem>>, vector<8x32xf32>
    %c0_1 = arith.constant 0 : index
    %c0_2 = arith.constant 0 : index
    %1 = vector.load %arg2[%c0_1, %c0_2] : memref<8x1xi32, #tpu.memory_space<vmem>>, vector<8x1xi32>
    %cst = arith.constant dense<0xFF800000> : vector<8xf32>
    %2 = vector.multi_reduction <maximumf>, %0, %cst [1] : vector<8x32xf32> to vector<8xf32>
    %3 = vector.shape_cast %2 : vector<8xf32> to vector<8x1xf32>
    %4 = vector.broadcast %3 : vector<8x1xf32> to vector<8x32xf32>
    %5 = arith.subf %0, %4 : vector<8x32xf32>
    %6 = math.exp %5 : vector<8x32xf32>
    %cst_3 = arith.constant dense<0.000000e+00> : vector<8xf32>
    %7 = vector.multi_reduction <add>, %6, %cst_3 [1] : vector<8x32xf32> to vector<8xf32>
    %8 = vector.shape_cast %7 : vector<8xf32> to vector<8x1xf32>
    %9 = tpu.iota {dimensions = array<i32: 1>} : vector<8x32xi32>
    %10 = vector.broadcast %1 : vector<8x1xi32> to vector<8x32xi32>
    %11 = arith.cmpi eq, %9, %10 : vector<8x32xi32>
    %cst_4 = arith.constant 0.000000e+00 : f32
    %12 = vector.broadcast %cst_4 : f32 to vector<8x32xf32>
    %13 = arith.select %11, %5, %12 : vector<8x32xi1>, vector<8x32xf32>
    %cst_5 = arith.constant dense<0.000000e+00> : vector<8xf32>
    %14 = vector.multi_reduction <add>, %13, %cst_5 [1] : vector<8x32xf32> to vector<8xf32>
    %15 = vector.shape_cast %14 : vector<8xf32> to vector<8x1xf32>
    %16 = math.log %8 : vector<8x1xf32>
    %17 = arith.subf %16, %15 : vector<8x1xf32>
    %cst_6 = arith.constant 0.000000e+00 : f32
    %18 = vector.broadcast %cst_6 : f32 to vector<8x1xf32>
    %19 = arith.subf %18, %17 : vector<8x1xf32>
    %20 = math.exp %19 : vector<8x1xf32>
    %cst_7 = arith.constant 1.000000e+00 : f32
    %21 = vector.broadcast %cst_7 : f32 to vector<8x1xf32>
    %22 = arith.subf %21, %20 : vector<8x1xf32>
    %cst_8 = arith.constant 1.000000e+00 : f32
    %23 = vector.broadcast %cst_8 : f32 to vector<8x1xf32>
    %24 = arith.mulf %23, %22 : vector<8x1xf32>
    %25 = arith.mulf %24, %22 : vector<8x1xf32>
    %cst_9 = arith.constant 1.000000e+00 : f32
    %26 = vector.broadcast %cst_9 : f32 to vector<8x1xf32>
    %27 = arith.mulf %26, %25 : vector<8x1xf32>
    %28 = arith.mulf %27, %17 : vector<8x1xf32>
    %c8_i32 = arith.constant 8 : i32
    %29 = arith.muli %arg0, %c8_i32 : i32
    %30 = tpu.iota {dimensions = array<i32: 0>} : vector<8x1xi32>
    %31 = vector.broadcast %29 : i32 to vector<8x1xi32>
    %32 = arith.addi %31, %30 : vector<8x1xi32>
    %c8_i32_10 = arith.constant 8 : i32
    %33 = vector.broadcast %c8_i32_10 : i32 to vector<8x1xi32>
    %34 = arith.cmpi slt, %32, %33 : vector<8x1xi32>
    %cst_11 = arith.constant 0.000000e+00 : f32
    %35 = vector.broadcast %cst_11 : f32 to vector<8x1xf32>
    %36 = arith.select %34, %28, %35 : vector<8x1xi1>, vector<8x1xf32>
    %cst_12 = arith.constant dense<0.000000e+00> : vector<1xf32>
    %37 = vector.multi_reduction <add>, %36, %cst_12 [0] : vector<8x1xf32> to vector<1xf32>
    %38 = vector.shape_cast %37 : vector<1xf32> to vector<1x1xf32>
    %39 = vector.shape_cast %38 : vector<1x1xf32> to vector<1x1xf32>
    %40 = vector.broadcast %39 : vector<1x1xf32> to vector<8x128xf32>
    %c0_13 = arith.constant 0 : index
    %c0_14 = arith.constant 0 : index
    %41 = vector.load %arg3[%c0_13, %c0_14] : memref<8x128xf32, #tpu.memory_space<vmem>>, vector<8x128xf32>
    tpu.vector_store %arg3[%c0_13, %c0_14], %40 {strides = array<i32>} : memref<8x128xf32, #tpu.memory_space<vmem>>, vector<8x128xf32>,
    return
  }
  func.func @transform_0(%arg0: i32) -> (i32, i32) {
    %c0_i32 = arith.constant 0 : i32
    %c0_i32_0 = arith.constant 0 : i32
    return %arg0, %c0_i32 : i32, i32
  }
  func.func @transform_1(%arg0: i32) -> (i32, i32) {
    %c0_i32 = arith.constant 0 : i32
    %c0_i32_0 = arith.constant 0 : i32
    return %arg0, %c0_i32 : i32, i32
  }
  func.func @transform_2(%arg0: i32) -> (i32, i32) {
    %c0_i32 = arith.constant 0 : i32
    %c0_i32_0 = arith.constant 0 : i32
    return %arg0, %c0_i32 : i32, i32
  }
}

</mosaic_0001>

<bundles_post_ra>
// kernel: tpu_custom_call.1
= control target key start
LH: loop header
LB: loop body
LE: loop exit
PB: predicated region body
PF: predicated region fallthrough
CT: control target
= control target key end

     0   :  { %vm14_vm0 = vcmask 261120   ;;  %s142_s0 = inlined_call_operand.vmem [shape: f32[8,32], index: 0, kind: input, shape index: {}]   ;;  %s143_s1 = inlined_call_operand.vmem [shape: s32[8,1], index: 1, kind: input, shape index: {}]   ;;  %s144_s2 = inlined_call_operand.hbm [shape: f32[8,128], index: 2, kind: output, shape index: {}]  }
   0x1   :  { %v12_v0 = vld [vmem:[%s142_s0] sm:$0xff] }
   0x2   :  { %7 = vsyncpa [#allocation3], 0  ;;  %v15_v1 = vsel %vm14_vm0, %v12_v0, -inf  ;;  %v104_v2 = vmov 0   ;;  %v13_v3 = vld [vmem:[%s143_s1] sm:$0xff]  ;;  %v24_v7 = vlaneseq  ;;  %s105_s0 = smov [#allocation2]  }
   0x3   :  { %73 = vset.pattern.permute.xlu0 %v104_v2  ;;  %s63_s1 = sshll.u32 %s105_s0, 4  ;;  %s64_s1 = int_to_ptr.vmem [resolvable:$true] %s63_s1 }
   0x4   :  { %16 = vmax.xlane.f32.xlu0 %v15_v1  ;;  %v25_v8 = vand.u32 127, %v24_v7  ;;  %s80_s13 = scalar_lea.vmem %s64_s1, 128  ;;  %p85_p1 = scmp.lt.s32.totalorder %s64_s1, %s64_s1 }
   0x5   :  { %p81_p0 = scmp.ne.s32.totalorder %s64_s1, %s80_s13  ;;  %p86_p2 = scmp.lt.s32.totalorder %s80_s13, %s80_s13 }
   0x7   :  { %p87_p3 = por %p86_p2, %p85_p1 }
   0x9   :  { %p88_p4 = pnand %p87_p3, %p81_p0 }
  0x1a   :  { %27 = vperm.xlu0 %73, %v13_v3  }
  0x91   :  { %v17_v4 = vpop.xlane.xlu0 %16 }
  0x92   :  { %v18_v5 = vsub.f32 %v12_v0, %v17_v4 }
  0x94   :  { %v19_v6 = vmul.f32 1.442695, %v18_v5 }
  0x96   :  { %74 = vpow2.f32 %v19_v6 }
  0x99   :  { %v28_v9 = vpop.permute.xlu0 %27 }
  0x9a   :  { %vm29_vm1 = vcmp.eq.s32.totalorder %v25_v8, %v28_v9 }
  0x9b   :  { %v30_v12 = vsel %vm29_vm1, %v18_v5, 0.0 }
  0x9c   :  { %v31_v13 = vsel %vm14_vm0, %v30_v12, 0.0 }
  0xa0   :  { %v75_v10 = vpop.eup %74 }
  0xa1   :  { %v21_v11 = vsel %vm14_vm0, %v75_v10, 0.0 }
  0xa2   :  { %22 = vadd.xlane.f32.xlu1 %v21_v11 }
  0xa6   :  { %32 = vadd.xlane.f32.xlu1 %v31_v13 }
 0x12f   :  { %v23_v14 = vpop.xlane.xlu1 %22 }
 0x130   :  { %76 = vlog2.f32 %v23_v14 }
 0x133   :  { %v33_v17 = vpop.xlane.xlu1 %32 }
 0x13a   :  { %v77_v15 = vpop.eup %76 }
 0x13b   :  { %v35_v16 = vmul.f32 0.6931472, %v77_v15 }
 0x13d   :  { %v36_v18 = vsub.f32 %v35_v16, %v33_v17 }
 0x13f   :  { %v37_v19 = vsub.f32 0.0, %v36_v18 }
 0x141   :  { %v38_v20 = vmul.f32 1.442695, %v37_v19 }
 0x143   :  { %78 = vpow2.f32 %v38_v20 }
 0x14d   :  { %v79_v21 = vpop.eup %78 }
 0x14e   :  { %v40_v22 = vsub.f32 1.0, %v79_v21 }
 0x150   :  { %v41_v23 = vmul.f32 %v40_v22, %v40_v22 }
 0x152   :  { %v42_v24 = vmul.f32 %v41_v23, %v36_v18 }
 0x154   :  { %v50_v25 = vrot.slane %v42_v24, 4 }
 0x156   :  { %v51_v26 = vadd.f32 %v50_v25, %v42_v24 }
 0x158   :  { %v52_v27 = vrot.slane %v51_v26, 2 }
 0x15a   :  { %v53_v28 = vadd.f32 %v52_v27, %v51_v26 }
 0x15c   :  { %v54_v29 = vrot.slane %v53_v28, 1 }
 0x15e   :  { %v55_v30 = vadd.f32 %v54_v29, %v53_v28 }
 0x160   :  { %56 = vst [vmem:[#allocation2] sm:$0xff] %v55_v30 }
 0x161   :  { %91 = shalt.err (!%p88_p4)
}
 0x162   :  { %s92_s16 = scalar_lea.hbm %s144_s2, 128 }
 0x163   :  { %p93_p5 = scmp.ne.s32.totalorder %s144_s2, %s92_s16  ;;  %p96_p6 = scmp.lt.u32.totalorder %s92_s16, %s144_s2 }
 0x165   :  { %p98_p7 = pnand %p96_p6, %p93_p5 }
 0x167   :  { %101 = shalt.err (!%p98_p7)
}
 0x168   :  { %66 = dma.vmem_to_hbm [thread:$0]  %s64_s1, 128, %s144_s2, [#allocation3]  }
 0x169   :  { %102 = dma.done.wait [#allocation3], 128  }
 0x16a   :  { %103 = vsyncadd [#allocation3], 4294967168 }
 0x16b   :  { %70 = vsyncpa [#allocation3], 1 }

</bundles_post_ra>
